<compile_context>
chip_gen: v6e
topology: v6e:2x2x1
jax: 0.10.0
libtpu: 0.0.40
codegen_flags: <defaults>
</compile_context>

<pallas_src>
import functools

import jax
import jax.numpy as jnp
from jax.experimental import pallas as pl
from jax.experimental.pallas import tpu as pltpu

BN_EPS = 1e-5


def _pad_lanes(v, lpad, rpad):
    """Zero-pad the last (lane) axis of a 2-D value (rim only, no scratch)."""
    parts = []
    if lpad:
        parts.append(jnp.zeros(v.shape[:-1] + (lpad,), v.dtype))
    parts.append(v)
    if rpad:
        parts.append(jnp.zeros(v.shape[:-1] + (rpad,), v.dtype))
    return jnp.concatenate(parts, axis=-1) if len(parts) > 1 else v


def _bn_relu(per_sample, gamma, beta, *, relu):
    """Training-mode BatchNorm1d across the whole batch (+ optional ReLU).

    per_sample: list of (C, Lx) f32 values (one per batch sample).
    gamma/beta: (C, 1) f32.  Stats are per-channel over (N, Lx), biased var.
    """
    cnt = float(len(per_sample) * per_sample[0].shape[-1])
    tot = per_sample[0].sum(axis=-1, keepdims=True)
    for v in per_sample[1:]:
        tot = tot + v.sum(axis=-1, keepdims=True)
    mean = tot / cnt                                          # (C, 1)
    sq = ((per_sample[0] - mean) ** 2).sum(axis=-1, keepdims=True)
    for v in per_sample[1:]:
        sq = sq + ((v - mean) ** 2).sum(axis=-1, keepdims=True)
    var = sq / cnt                                            # biased variance
    scale = gamma * jax.lax.rsqrt(var + BN_EPS)               # (C, 1)
    shift = beta - mean * scale
    out = []
    for v in per_sample:
        y = v * scale + shift
        out.append(jnp.maximum(y, 0.0) if relu else y)
    return out


def resblock_kernel(*refs, N, L, Cin, Cout, K, S, P, has_down):
    if has_down:
        (xp_ref, w1_ref, w2_ref, wd_ref,
         g1_ref, b1_ref, g2_ref, b2_ref, gd_ref, bd_ref, o_ref) = refs
    else:
        (xp_ref, w1_ref, w2_ref,
         g1_ref, b1_ref, g2_ref, b2_ref, o_ref) = refs

    Lf1 = L + 2 * P - K + 1            # layer1 stride-1 (full) output length
    L1 = (L + 2 * P - K) // S + 1      # layer1 output length
    L2 = L1 + 2 * P - K + 1            # layer2 output length (stride 1)
    Ld = (L - 1) // S + 1 if has_down else L
    diff = L2 - Ld

    xs = [xp_ref[n] for n in range(N)]          # each (Cin, L + 2P), L on lanes

    # ---------------- layer1: conv(stride S) -> BN -> ReLU -------------------
    # TODO(synk): Mosaic's dot lowering wants rank-2 operands, so the K taps
    # are K accumulated 2-D dots rather than one im2col dot (K*Cin stays tiny).
    h1 = []
    for n in range(N):
        acc = jnp.dot(w1_ref[0], xs[n][:, 0:Lf1],
                      preferred_element_type=jnp.float32)     # (Cout, Lf1)
        for k in range(1, K):
            acc = acc + jnp.dot(w1_ref[k], xs[n][:, k:k + Lf1],
                                preferred_element_type=jnp.float32)
        if S > 1:
            acc = acc[:, ::S]                                 # (Cout, L1)
        h1.append(acc)
    h1 = _bn_relu(h1, g1_ref[...], b1_ref[...], relu=True)

    # ---------------- layer2: conv(stride 1, pad P) -> BN -> ReLU ------------
    h2 = []
    for n in range(N):
        xin = _pad_lanes(h1[n], P, P)                         # (Cout, L1 + 2P)
        acc = jnp.dot(w2_ref[0], xin[:, 0:L2],
                      preferred_element_type=jnp.float32)     # (Cout, L2)
        for k in range(1, K):
            acc = acc + jnp.dot(w2_ref[k], xin[:, k:k + L2],
                                preferred_element_type=jnp.float32)
        h2.append(acc)
    h2 = _bn_relu(h2, g2_ref[...], b2_ref[...], relu=True)

    # ---------------- identity / downsample path -----------------------------
    if has_down:
        ident = []
        for n in range(N):
            v = jnp.dot(wd_ref[...], xs[n][:, P:P + L],
                        preferred_element_type=jnp.float32)   # (Cout, L)
            if S > 1:
                v = v[:, ::S]                                 # (Cout, Ld)
            ident.append(v)
        ident = _bn_relu(ident, gd_ref[...], bd_ref[...], relu=False)
    else:
        ident = [xs[n][:, P:P + L] for n in range(N)]         # Cin == Cout

    # -------- align lengths + residual add + final ReLU + single store -------
    for n in range(N):
        out_n, id_n = h2[n], ident[n]
        if diff > 0:
            id_n = _pad_lanes(id_n, diff // 2, diff - diff // 2)
        elif diff < 0:
            # TODO(synk): the reference's diff < 0 branch uses an inconsistent
            # F.pad spec that errors in PyTorch; `out` is padded symmetrically.
            out_n = _pad_lanes(out_n, (-diff) // 2, (-diff) - (-diff) // 2)
        o_ref[n] = jnp.maximum(out_n + id_n, 0.0).astype(o_ref.dtype)


def resblock_forward(x_ncl, params, *, kernel_size, stride, padding):
    """x_ncl: (N, Cin, L) float32.  Returns (N, Cout, Lout) — same layout as torch."""
    w1_t, w2_t, wd_t, g1, b1, g2, b2, gd, bd = params
    N, Cin, L = x_ncl.shape
    Cout = w1_t.shape[0]
    K, S, P = kernel_size, stride, padding
    has_down = (S != 1) or (Cin != Cout)

    L1 = (L + 2 * P - K) // S + 1
    L2 = L1 + 2 * P - K + 1
    Ld = (L - 1) // S + 1 if has_down else L
    Lout = max(L2, Ld)

    # Pre-pad along L only; channels stay where they are (no layout transposes,
    # L stays on the lane axis all the way through the kernel).
    xp = jnp.pad(x_ncl.astype(jnp.float32), ((0, 0), (0, 0), (P, P)))

    # Weights: (Cout, Cin, K) -> (K, Cout, Cin): each tap is a ready 2-D matmul LHS.
    w1 = jnp.transpose(w1_t, (2, 0, 1)).astype(jnp.float32)   # (K, Cout, Cin)
    w2 = jnp.transpose(w2_t, (2, 0, 1)).astype(jnp.float32)   # (K, Cout, Cout)
    col = lambda v: v.reshape(-1, 1).astype(jnp.float32)      # (Cout, 1)

    args = [xp, w1, w2]
    if has_down:
        args.append(wd_t[:, :, 0].astype(jnp.float32))        # (Cout, Cin)
    args += [col(g1), col(b1), col(g2), col(b2)]
    if has_down:
        args += [col(gd), col(bd)]

    # TODO(synk): batch-global training-mode BN stats force a single-program
    # kernel; a two-pass BN split (stats pass + normalize/conv pass) would
    # allow gridding over N/L with 'parallel' semantics for megacore sharding.
    kern = functools.partial(resblock_kernel, N=N, L=L, Cin=Cin, Cout=Cout,
                             K=K, S=S, P=P, has_down=has_down)
    vmem = pl.BlockSpec(memory_space=pltpu.MemorySpace.VMEM)
    out = pl.pallas_call(
        kern,
        out_shape=jax.ShapeDtypeStruct((N, Cout, Lout), jnp.float32),
        in_specs=[vmem] * len(args),
        out_specs=vmem,
        compiler_params=pltpu.CompilerParams(
            vmem_limit_bytes=48 * 1024 * 1024),
    )(*args)
    return out


def resblock_ref(x, params, *, kernel_size, stride, padding):
    """Pure-JAX reference (NCL layout), mirrors the PyTorch module."""
    w1, w2, wd, g1, b1, g2, b2, gd, bd = params
    conv = lambda a, w, s, p: jax.lax.conv_general_dilated(
        a, w, (s,), [(p, p)], dimension_numbers=('NCH', 'OIH', 'NCH'))

    def bn(a, g, b):
        m = jnp.mean(a, axis=(0, 2), keepdims=True)
        v = jnp.mean((a - m) ** 2, axis=(0, 2), keepdims=True)
        return (a - m) * jax.lax.rsqrt(v + BN_EPS) * g[None, :, None] + b[None, :, None]

    Cin, Cout = x.shape[1], w1.shape[0]
    if stride != 1 or Cin != Cout:
        ident = bn(conv(x, wd, stride, 0), gd, bd)
    else:
        ident = x
    out = jax.nn.relu(bn(conv(x, w1, stride, padding), g1, b1))
    out = jax.nn.relu(bn(conv(out, w2, 1, padding), g2, b2))
    return jax.nn.relu(out + ident)   # demo shapes: lengths already match


if __name__ == "__main__":
    # ResBlock(input_channels=4, output_channels=8, kernel_size=3, stride=1, padding=1)
    N, Cin, Cout, L, K, S, P = 2, 4, 8, 16, 3, 1, 1

    key = jax.random.PRNGKey(0)
    ks = jax.random.split(key, 10)
    w1 = 0.3 * jax.random.normal(ks[0], (Cout, Cin, K), jnp.float32)   # conv1 weight
    w2 = 0.3 * jax.random.normal(ks[1], (Cout, Cout, K), jnp.float32)  # conv2 weight
    wd = 0.3 * jax.random.normal(ks[2], (Cout, Cin, 1), jnp.float32)   # 1x1 downsample
    g1 = 1.0 + 0.1 * jax.random.normal(ks[3], (Cout,), jnp.float32)
    b1 = 0.1 * jax.random.normal(ks[4], (Cout,), jnp.float32)
    g2 = 1.0 + 0.1 * jax.random.normal(ks[5], (Cout,), jnp.float32)
    b2 = 0.1 * jax.random.normal(ks[6], (Cout,), jnp.float32)
    gd = 1.0 + 0.1 * jax.random.normal(ks[7], (Cout,), jnp.float32)
    bd = 0.1 * jax.random.normal(ks[8], (Cout,), jnp.float32)
    params = (w1, w2, wd, g1, b1, g2, b2, gd, bd)

    x = jax.random.normal(ks[9], (N, Cin, L), jnp.float32)

    out = resblock_forward(x, params, kernel_size=K, stride=S, padding=P)
    out = jax.block_until_ready(out)

    ref = jax.block_until_ready(
        resblock_ref(x, params, kernel_size=K, stride=S, padding=P))

    assert out.shape == ref.shape, (out.shape, ref.shape)
    assert jnp.allclose(out, ref, atol=1e-3, rtol=1e-3), float(
        jnp.max(jnp.abs(out - ref)))
    print("KERNEL_OK")
</pallas_src>

<mosaic_0001>
module attributes {stable_mosaic.version = 11 : i64} {
  func.func @resblock_kernel(%arg0: memref<2x4x18xf32, #tpu.memory_space<vmem>>, %arg1: memref<3x8x4xf32, #tpu.memory_space<vmem>>, %arg2: memref<3x8x8xf32, #tpu.memory_space<vmem>>, %arg3: memref<8x4xf32, #tpu.memory_space<vmem>>, %arg4: memref<8x1xf32, #tpu.memory_space<vmem>>, %arg5: memref<8x1xf32, #tpu.memory_space<vmem>>, %arg6: memref<8x1xf32, #tpu.memory_space<vmem>>, %arg7: memref<8x1xf32, #tpu.memory_space<vmem>>, %arg8: memref<8x1xf32, #tpu.memory_space<vmem>>, %arg9: memref<8x1xf32, #tpu.memory_space<vmem>>, %arg10: memref<2x8x16xf32, #tpu.memory_space<vmem>>) attributes {dimension_semantics = [], scalar_prefetch = 0 : i64, scratch_operands = 0 : i64, tpu.core_type = #tpu.core_type<tc>} {
    %c0 = arith.constant 0 : index
    %c0_0 = arith.constant 0 : index
    %c0_1 = arith.constant 0 : index
    %0 = vector.load %arg0[%c0, %c0_0, %c0_1] : memref<2x4x18xf32, #tpu.memory_space<vmem>>, vector<1x4x18xf32>
    %1 = vector.shape_cast %0 : vector<1x4x18xf32> to vector<4x18xf32>
    %c1 = arith.constant 1 : index
    %c0_2 = arith.constant 0 : index
    %c0_3 = arith.constant 0 : index
    %2 = vector.load %arg0[%c1, %c0_2, %c0_3] : memref<2x4x18xf32, #tpu.memory_space<vmem>>, vector<1x4x18xf32>
    %3 = vector.shape_cast %2 : vector<1x4x18xf32> to vector<4x18xf32>
    %c0_4 = arith.constant 0 : index
    %c0_5 = arith.constant 0 : index
    %c0_6 = arith.constant 0 : index
    %4 = vector.load %arg1[%c0_4, %c0_5, %c0_6] : memref<3x8x4xf32, #tpu.memory_space<vmem>>, vector<1x8x4xf32>
    %5 = vector.shape_cast %4 : vector<1x8x4xf32> to vector<8x4xf32>
    %6 = vector.extract_strided_slice %1 {offsets = [0, 0], sizes = [4, 16], strides = [1, 1]} : vector<4x18xf32> to vector<4x16xf32>
    %cst = arith.constant dense<0.000000e+00> : vector<8x16xf32>
    %7 = tpu.matmul %5, %6, %cst {dimension_numbers = #tpu.dot_dimension_numbers<[1], [0], [0], [1], [0, 0, 1, 1], [], []>} : vector<8x4xf32>, vector<4x16xf32>, vector<8x16xf32> -> vector<8x16xf32>
    %c1_7 = arith.constant 1 : index
    %c0_8 = arith.constant 0 : index
    %c0_9 = arith.constant 0 : index
    %8 = vector.load %arg1[%c1_7, %c0_8, %c0_9] : memref<3x8x4xf32, #tpu.memory_space<vmem>>, vector<1x8x4xf32>
    %9 = vector.shape_cast %8 : vector<1x8x4xf32> to vector<8x4xf32>
    %10 = vector.extract_strided_slice %1 {offsets = [0, 1], sizes = [4, 16], strides = [1, 1]} : vector<4x18xf32> to vector<4x16xf32>
    %cst_10 = arith.constant dense<0.000000e+00> : vector<8x16xf32>
    %11 = tpu.matmul %9, %10, %cst_10 {dimension_numbers = #tpu.dot_dimension_numbers<[1], [0], [0], [1], [0, 0, 1, 1], [], []>} : vector<8x4xf32>, vector<4x16xf32>, vector<8x16xf32> -> vector<8x16xf32>
    %12 = arith.addf %7, %11 : vector<8x16xf32>
    %c2 = arith.constant 2 : index
    %c0_11 = arith.constant 0 : index
    %c0_12 = arith.constant 0 : index
    %13 = vector.load %arg1[%c2, %c0_11, %c0_12] : memref<3x8x4xf32, #tpu.memory_space<vmem>>, vector<1x8x4xf32>
    %14 = vector.shape_cast %13 : vector<1x8x4xf32> to vector<8x4xf32>
    %15 = vector.extract_strided_slice %1 {offsets = [0, 2], sizes = [4, 16], strides = [1, 1]} : vector<4x18xf32> to vector<4x16xf32>
    %cst_13 = arith.constant dense<0.000000e+00> : vector<8x16xf32>
    %16 = tpu.matmul %14, %15, %cst_13 {dimension_numbers = #tpu.dot_dimension_numbers<[1], [0], [0], [1], [0, 0, 1, 1], [], []>} : vector<8x4xf32>, vector<4x16xf32>, vector<8x16xf32> -> vector<8x16xf32>
    %17 = arith.addf %12, %16 : vector<8x16xf32>
    %c0_14 = arith.constant 0 : index
    %c0_15 = arith.constant 0 : index
    %c0_16 = arith.constant 0 : index
    %18 = vector.load %arg1[%c0_14, %c0_15, %c0_16] : memref<3x8x4xf32, #tpu.memory_space<vmem>>, vector<1x8x4xf32>
    %19 = vector.shape_cast %18 : vector<1x8x4xf32> to vector<8x4xf32>
    %20 = vector.extract_strided_slice %3 {offsets = [0, 0], sizes = [4, 16], strides = [1, 1]} : vector<4x18xf32> to vector<4x16xf32>
    %cst_17 = arith.constant dense<0.000000e+00> : vector<8x16xf32>
    %21 = tpu.matmul %19, %20, %cst_17 {dimension_numbers = #tpu.dot_dimension_numbers<[1], [0], [0], [1], [0, 0, 1, 1], [], []>} : vector<8x4xf32>, vector<4x16xf32>, vector<8x16xf32> -> vector<8x16xf32>
    %c1_18 = arith.constant 1 : index
    %c0_19 = arith.constant 0 : index
    %c0_20 = arith.constant 0 : index
    %22 = vector.load %arg1[%c1_18, %c0_19, %c0_20] : memref<3x8x4xf32, #tpu.memory_space<vmem>>, vector<1x8x4xf32>
    %23 = vector.shape_cast %22 : vector<1x8x4xf32> to vector<8x4xf32>
    %24 = vector.extract_strided_slice %3 {offsets = [0, 1], sizes = [4, 16], strides = [1, 1]} : vector<4x18xf32> to vector<4x16xf32>
    %cst_21 = arith.constant dense<0.000000e+00> : vector<8x16xf32>
    %25 = tpu.matmul %23, %24, %cst_21 {dimension_numbers = #tpu.dot_dimension_numbers<[1], [0], [0], [1], [0, 0, 1, 1], [], []>} : vector<8x4xf32>, vector<4x16xf32>, vector<8x16xf32> -> vector<8x16xf32>
    %26 = arith.addf %21, %25 : vector<8x16xf32>
    %c2_22 = arith.constant 2 : index
    %c0_23 = arith.constant 0 : index
    %c0_24 = arith.constant 0 : index
    %27 = vector.load %arg1[%c2_22, %c0_23, %c0_24] : memref<3x8x4xf32, #tpu.memory_space<vmem>>, vector<1x8x4xf32>
    %28 = vector.shape_cast %27 : vector<1x8x4xf32> to vector<8x4xf32>
    %29 = vector.extract_strided_slice %3 {offsets = [0, 2], sizes = [4, 16], strides = [1, 1]} : vector<4x18xf32> to vector<4x16xf32>
    %cst_25 = arith.constant dense<0.000000e+00> : vector<8x16xf32>
    %30 = tpu.matmul %28, %29, %cst_25 {dimension_numbers = #tpu.dot_dimension_numbers<[1], [0], [0], [1], [0, 0, 1, 1], [], []>} : vector<8x4xf32>, vector<4x16xf32>, vector<8x16xf32> -> vector<8x16xf32>
    %31 = arith.addf %26, %30 : vector<8x16xf32>
    %c0_26 = arith.constant 0 : index
    %c0_27 = arith.constant 0 : index
    %32 = vector.load %arg4[%c0_26, %c0_27] : memref<8x1xf32, #tpu.memory_space<vmem>>, vector<8x1xf32>
    %c0_28 = arith.constant 0 : index
    %c0_29 = arith.constant 0 : index
    %33 = vector.load %arg5[%c0_28, %c0_29] : memref<8x1xf32, #tpu.memory_space<vmem>>, vector<8x1xf32>
    %cst_30 = arith.constant dense<0.000000e+00> : vector<8xf32>
    %34 = vector.multi_reduction <add>, %17, %cst_30 [1] : vector<8x16xf32> to vector<8xf32>
    %35 = vector.shape_cast %34 : vector<8xf32> to vector<8x1xf32>
    %cst_31 = arith.constant dense<0.000000e+00> : vector<8xf32>
    %36 = vector.multi_reduction <add>, %31, %cst_31 [1] : vector<8x16xf32> to vector<8xf32>
    %37 = vector.shape_cast %36 : vector<8xf32> to vector<8x1xf32>
    %38 = arith.addf %35, %37 : vector<8x1xf32>
    %cst_32 = arith.constant 3.200000e+01 : f32
    %39 = vector.broadcast %cst_32 : f32 to vector<8x1xf32>
    %40 = arith.divf %38, %39 : vector<8x1xf32>
    %41 = vector.broadcast %40 : vector<8x1xf32> to vector<8x16xf32>
    %42 = arith.subf %17, %41 : vector<8x16xf32>
    %43 = arith.mulf %42, %42 : vector<8x16xf32>
    %cst_33 = arith.constant dense<0.000000e+00> : vector<8xf32>
    %44 = vector.multi_reduction <add>, %43, %cst_33 [1] : vector<8x16xf32> to vector<8xf32>
    %45 = vector.shape_cast %44 : vector<8xf32> to vector<8x1xf32>
    %46 = vector.broadcast %40 : vector<8x1xf32> to vector<8x16xf32>
    %47 = arith.subf %31, %46 : vector<8x16xf32>
    %48 = arith.mulf %47, %47 : vector<8x16xf32>
    %cst_34 = arith.constant dense<0.000000e+00> : vector<8xf32>
    %49 = vector.multi_reduction <add>, %48, %cst_34 [1] : vector<8x16xf32> to vector<8xf32>
    %50 = vector.shape_cast %49 : vector<8xf32> to vector<8x1xf32>
    %51 = arith.addf %45, %50 : vector<8x1xf32>
    %cst_35 = arith.constant 3.200000e+01 : f32
    %52 = vector.broadcast %cst_35 : f32 to vector<8x1xf32>
    %53 = arith.divf %51, %52 : vector<8x1xf32>
    %cst_36 = arith.constant 9.99999974E-6 : f32
    %54 = vector.broadcast %cst_36 : f32 to vector<8x1xf32>
    %55 = arith.addf %53, %54 : vector<8x1xf32>
    %56 = math.rsqrt %55 : vector<8x1xf32>
    %57 = arith.mulf %32, %56 : vector<8x1xf32>
    %58 = arith.mulf %40, %57 : vector<8x1xf32>
    %59 = arith.subf %33, %58 : vector<8x1xf32>
    %60 = vector.broadcast %57 : vector<8x1xf32> to vector<8x16xf32>
    %61 = arith.mulf %17, %60 : vector<8x16xf32>
    %62 = vector.broadcast %59 : vector<8x1xf32> to vector<8x16xf32>
    %63 = arith.addf %61, %62 : vector<8x16xf32>
    %cst_37 = arith.constant 0.000000e+00 : f32
    %64 = vector.broadcast %cst_37 : f32 to vector<8x16xf32>
    %65 = arith.maximumf %63, %64 : vector<8x16xf32>
    %66 = vector.broadcast %57 : vector<8x1xf32> to vector<8x16xf32>
    %67 = arith.mulf %31, %66 : vector<8x16xf32>
    %68 = vector.broadcast %59 : vector<8x1xf32> to vector<8x16xf32>
    %69 = arith.addf %67, %68 : vector<8x16xf32>
    %cst_38 = arith.constant 0.000000e+00 : f32
    %70 = vector.broadcast %cst_38 : f32 to vector<8x16xf32>
    %71 = arith.maximumf %69, %70 : vector<8x16xf32>
    %cst_39 = arith.constant 0.000000e+00 : f32
    %72 = vector.broadcast %cst_39 : f32 to vector<8x1xf32>
    %cst_40 = arith.constant 0.000000e+00 : f32
    %73 = vector.broadcast %cst_40 : f32 to vector<8x1xf32>
    %74 = tpu.concatenate %72, %65, %73 in 1 : vector<8x1xf32>, vector<8x16xf32>, vector<8x1xf32> -> vector<8x18xf32>
    %c0_41 = arith.constant 0 : index
    %c0_42 = arith.constant 0 : index
    %c0_43 = arith.constant 0 : index
    %75 = vector.load %arg2[%c0_41, %c0_42, %c0_43] : memref<3x8x8xf32, #tpu.memory_space<vmem>>, vector<1x8x8xf32>
    %76 = vector.shape_cast %75 : vector<1x8x8xf32> to vector<8x8xf32>
    %77 = vector.extract_strided_slice %74 {offsets = [0, 0], sizes = [8, 16], strides = [1, 1]} : vector<8x18xf32> to vector<8x16xf32>
    %cst_44 = arith.constant dense<0.000000e+00> : vector<8x16xf32>
    %78 = tpu.matmul %76, %77, %cst_44 {dimension_numbers = #tpu.dot_dimension_numbers<[1], [0], [0], [1], [0, 0, 1, 1], [], []>} : vector<8x8xf32>, vector<8x16xf32>, vector<8x16xf32> -> vector<8x16xf32>
    %c1_45 = arith.constant 1 : index
    %c0_46 = arith.constant 0 : index
    %c0_47 = arith.constant 0 : index
    %79 = vector.load %arg2[%c1_45, %c0_46, %c0_47] : memref<3x8x8xf32, #tpu.memory_space<vmem>>, vector<1x8x8xf32>
    %80 = vector.shape_cast %79 : vector<1x8x8xf32> to vector<8x8xf32>
    %81 = vector.extract_strided_slice %74 {offsets = [0, 1], sizes = [8, 16], strides = [1, 1]} : vector<8x18xf32> to vector<8x16xf32>
    %cst_48 = arith.constant dense<0.000000e+00> : vector<8x16xf32>
    %82 = tpu.matmul %80, %81, %cst_48 {dimension_numbers = #tpu.dot_dimension_numbers<[1], [0], [0], [1], [0, 0, 1, 1], [], []>} : vector<8x8xf32>, vector<8x16xf32>, vector<8x16xf32> -> vector<8x16xf32>
    %83 = arith.addf %78, %82 : vector<8x16xf32>
    %c2_49 = arith.constant 2 : index
    %c0_50 = arith.constant 0 : index
    %c0_51 = arith.constant 0 : index
    %84 = vector.load %arg2[%c2_49, %c0_50, %c0_51] : memref<3x8x8xf32, #tpu.memory_space<vmem>>, vector<1x8x8xf32>
    %85 = vector.shape_cast %84 : vector<1x8x8xf32> to vector<8x8xf32>
    %86 = vector.extract_strided_slice %74 {offsets = [0, 2], sizes = [8, 16], strides = [1, 1]} : vector<8x18xf32> to vector<8x16xf32>
    %cst_52 = arith.constant dense<0.000000e+00> : vector<8x16xf32>
    %87 = tpu.matmul %85, %86, %cst_52 {dimension_numbers = #tpu.dot_dimension_numbers<[1], [0], [0], [1], [0, 0, 1, 1], [], []>} : vector<8x8xf32>, vector<8x16xf32>, vector<8x16xf32> -> vector<8x16xf32>
    %88 = arith.addf %83, %87 : vector<8x16xf32>
    %cst_53 = arith.constant 0.000000e+00 : f32
    %89 = vector.broadcast %cst_53 : f32 to vector<8x1xf32>
    %cst_54 = arith.constant 0.000000e+00 : f32
    %90 = vector.broadcast %cst_54 : f32 to vector<8x1xf32>
    %91 = tpu.concatenate %89, %71, %90 in 1 : vector<8x1xf32>, vector<8x16xf32>, vector<8x1xf32> -> vector<8x18xf32>
    %c0_55 = arith.constant 0 : index
    %c0_56 = arith.constant 0 : index
    %c0_57 = arith.constant 0 : index
    %92 = vector.load %arg2[%c0_55, %c0_56, %c0_57] : memref<3x8x8xf32, #tpu.memory_space<vmem>>, vector<1x8x8xf32>
    %93 = vector.shape_cast %92 : vector<1x8x8xf32> to vector<8x8xf32>
    %94 = vector.extract_strided_slice %91 {offsets = [0, 0], sizes = [8, 16], strides = [1, 1]} : vector<8x18xf32> to vector<8x16xf32>
    %cst_58 = arith.constant dense<0.000000e+00> : vector<8x16xf32>
    %95 = tpu.matmul %93, %94, %cst_58 {dimension_numbers = #tpu.dot_dimension_numbers<[1], [0], [0], [1], [0, 0, 1, 1], [], []>} : vector<8x8xf32>, vector<8x16xf32>, vector<8x16xf32> -> vector<8x16xf32>
    %c1_59 = arith.constant 1 : index
    %c0_60 = arith.constant 0 : index
    %c0_61 = arith.constant 0 : index
    %96 = vector.load %arg2[%c1_59, %c0_60, %c0_61] : memref<3x8x8xf32, #tpu.memory_space<vmem>>, vector<1x8x8xf32>
    %97 = vector.shape_cast %96 : vector<1x8x8xf32> to vector<8x8xf32>
    %98 = vector.extract_strided_slice %91 {offsets = [0, 1], sizes = [8, 16], strides = [1, 1]} : vector<8x18xf32> to vector<8x16xf32>
    %cst_62 = arith.constant dense<0.000000e+00> : vector<8x16xf32>
    %99 = tpu.matmul %97, %98, %cst_62 {dimension_numbers = #tpu.dot_dimension_numbers<[1], [0], [0], [1], [0, 0, 1, 1], [], []>} : vector<8x8xf32>, vector<8x16xf32>, vector<8x16xf32> -> vector<8x16xf32>
    %100 = arith.addf %95, %99 : vector<8x16xf32>
    %c2_63 = arith.constant 2 : index
    %c0_64 = arith.constant 0 : index
    %c0_65 = arith.constant 0 : index
    %101 = vector.load %arg2[%c2_63, %c0_64, %c0_65] : memref<3x8x8xf32, #tpu.memory_space<vmem>>, vector<1x8x8xf32>
    %102 = vector.shape_cast %101 : vector<1x8x8xf32> to vector<8x8xf32>
    %103 = vector.extract_strided_slice %91 {offsets = [0, 2], sizes = [8, 16], strides = [1, 1]} : vector<8x18xf32> to vector<8x16xf32>
    %cst_66 = arith.constant dense<0.000000e+00> : vector<8x16xf32>
    %104 = tpu.matmul %102, %103, %cst_66 {dimension_numbers = #tpu.dot_dimension_numbers<[1], [0], [0], [1], [0, 0, 1, 1], [], []>} : vector<8x8xf32>, vector<8x16xf32>, vector<8x16xf32> -> vector<8x16xf32>
    %105 = arith.addf %100, %104 : vector<8x16xf32>
    %c0_67 = arith.constant 0 : index
    %c0_68 = arith.constant 0 : index
    %106 = vector.load %arg6[%c0_67, %c0_68] : memref<8x1xf32, #tpu.memory_space<vmem>>, vector<8x1xf32>
    %c0_69 = arith.constant 0 : index
    %c0_70 = arith.constant 0 : index
    %107 = vector.load %arg7[%c0_69, %c0_70] : memref<8x1xf32, #tpu.memory_space<vmem>>, vector<8x1xf32>
    %cst_71 = arith.constant dense<0.000000e+00> : vector<8xf32>
    %108 = vector.multi_reduction <add>, %88, %cst_71 [1] : vector<8x16xf32> to vector<8xf32>
    %109 = vector.shape_cast %108 : vector<8xf32> to vector<8x1xf32>
    %cst_72 = arith.constant dense<0.000000e+00> : vector<8xf32>
    %110 = vector.multi_reduction <add>, %105, %cst_72 [1] : vector<8x16xf32> to vector<8xf32>
    %111 = vector.shape_cast %110 : vector<8xf32> to vector<8x1xf32>
    %112 = arith.addf %109, %111 : vector<8x1xf32>
    %cst_73 = arith.constant 3.200000e+01 : f32
    %113 = vector.broadcast %cst_73 : f32 to vector<8x1xf32>
    %114 = arith.divf %112, %113 : vector<8x1xf32>
    %115 = vector.broadcast %114 : vector<8x1xf32> to vector<8x16xf32>
    %116 = arith.subf %88, %115 : vector<8x16xf32>
    %117 = arith.mulf %116, %116 : vector<8x16xf32>
    %cst_74 = arith.constant dense<0.000000e+00> : vector<8xf32>
    %118 = vector.multi_reduction <add>, %117, %cst_74 [1] : vector<8x16xf32> to vector<8xf32>
    %119 = vector.shape_cast %118 : vector<8xf32> to vector<8x1xf32>
    %120 = vector.broadcast %114 : vector<8x1xf32> to vector<8x16xf32>
    %121 = arith.subf %105, %120 : vector<8x16xf32>
    %122 = arith.mulf %121, %121 : vector<8x16xf32>
    %cst_75 = arith.constant dense<0.000000e+00> : vector<8xf32>
    %123 = vector.multi_reduction <add>, %122, %cst_75 [1] : vector<8x16xf32> to vector<8xf32>
    %124 = vector.shape_cast %123 : vector<8xf32> to vector<8x1xf32>
    %125 = arith.addf %119, %124 : vector<8x1xf32>
    %cst_76 = arith.constant 3.200000e+01 : f32
    %126 = vector.broadcast %cst_76 : f32 to vector<8x1xf32>
    %127 = arith.divf %125, %126 : vector<8x1xf32>
    %cst_77 = arith.constant 9.99999974E-6 : f32
    %128 = vector.broadcast %cst_77 : f32 to vector<8x1xf32>
    %129 = arith.addf %127, %128 : vector<8x1xf32>
    %130 = math.rsqrt %129 : vector<8x1xf32>
    %131 = arith.mulf %106, %130 : vector<8x1xf32>
    %132 = arith.mulf %114, %131 : vector<8x1xf32>
    %133 = arith.subf %107, %132 : vector<8x1xf32>
    %134 = vector.broadcast %131 : vector<8x1xf32> to vector<8x16xf32>
    %135 = arith.mulf %88, %134 : vector<8x16xf32>
    %136 = vector.broadcast %133 : vector<8x1xf32> to vector<8x16xf32>
    %137 = arith.addf %135, %136 : vector<8x16xf32>
    %cst_78 = arith.constant 0.000000e+00 : f32
    %138 = vector.broadcast %cst_78 : f32 to vector<8x16xf32>
    %139 = arith.maximumf %137, %138 : vector<8x16xf32>
    %140 = vector.broadcast %131 : vector<8x1xf32> to vector<8x16xf32>
    %141 = arith.mulf %105, %140 : vector<8x16xf32>
    %142 = vector.broadcast %133 : vector<8x1xf32> to vector<8x16xf32>
    %143 = arith.addf %141, %142 : vector<8x16xf32>
    %cst_79 = arith.constant 0.000000e+00 : f32
    %144 = vector.broadcast %cst_79 : f32 to vector<8x16xf32>
    %145 = arith.maximumf %143, %144 : vector<8x16xf32>
    %c0_80 = arith.constant 0 : index
    %c0_81 = arith.constant 0 : index
    %146 = vector.load %arg3[%c0_80, %c0_81] : memref<8x4xf32, #tpu.memory_space<vmem>>, vector<8x4xf32>
    %147 = vector.extract_strided_slice %1 {offsets = [0, 1], sizes = [4, 16], strides = [1, 1]} : vector<4x18xf32> to vector<4x16xf32>
    %cst_82 = arith.constant dense<0.000000e+00> : vector<8x16xf32>
    %148 = tpu.matmul %146, %147, %cst_82 {dimension_numbers = #tpu.dot_dimension_numbers<[1], [0], [0], [1], [0, 0, 1, 1], [], []>} : vector<8x4xf32>, vector<4x16xf32>, vector<8x16xf32> -> vector<8x16xf32>
    %c0_83 = arith.constant 0 : index
    %c0_84 = arith.constant 0 : index
    %149 = vector.load %arg3[%c0_83, %c0_84] : memref<8x4xf32, #tpu.memory_space<vmem>>, vector<8x4xf32>
    %150 = vector.extract_strided_slice %3 {offsets = [0, 1], sizes = [4, 16], strides = [1, 1]} : vector<4x18xf32> to vector<4x16xf32>
    %cst_85 = arith.constant dense<0.000000e+00> : vector<8x16xf32>
    %151 = tpu.matmul %149, %150, %cst_85 {dimension_numbers = #tpu.dot_dimension_numbers<[1], [0], [0], [1], [0, 0, 1, 1], [], []>} : vector<8x4xf32>, vector<4x16xf32>, vector<8x16xf32> -> vector<8x16xf32>
    %c0_86 = arith.constant 0 : index
    %c0_87 = arith.constant 0 : index
    %152 = vector.load %arg8[%c0_86, %c0_87] : memref<8x1xf32, #tpu.memory_space<vmem>>, vector<8x1xf32>
    %c0_88 = arith.constant 0 : index
    %c0_89 = arith.constant 0 : index
    %153 = vector.load %arg9[%c0_88, %c0_89] : memref<8x1xf32, #tpu.memory_space<vmem>>, vector<8x1xf32>
    %cst_90 = arith.constant dense<0.000000e+00> : vector<8xf32>
    %154 = vector.multi_reduction <add>, %148, %cst_90 [1] : vector<8x16xf32> to vector<8xf32>
    %155 = vector.shape_cast %154 : vector<8xf32> to vector<8x1xf32>
    %cst_91 = arith.constant dense<0.000000e+00> : vector<8xf32>
    %156 = vector.multi_reduction <add>, %151, %cst_91 [1] : vector<8x16xf32> to vector<8xf32>
    %157 = vector.shape_cast %156 : vector<8xf32> to vector<8x1xf32>
    %158 = arith.addf %155, %157 : vector<8x1xf32>
    %cst_92 = arith.constant 3.200000e+01 : f32
    %159 = vector.broadcast %cst_92 : f32 to vector<8x1xf32>
    %160 = arith.divf %158, %159 : vector<8x1xf32>
    %161 = vector.broadcast %160 : vector<8x1xf32> to vector<8x16xf32>
    %162 = arith.subf %148, %161 : vector<8x16xf32>
    %163 = arith.mulf %162, %162 : vector<8x16xf32>
    %cst_93 = arith.constant dense<0.000000e+00> : vector<8xf32>
    %164 = vector.multi_reduction <add>, %163, %cst_93 [1] : vector<8x16xf32> to vector<8xf32>
    %165 = vector.shape_cast %164 : vector<8xf32> to vector<8x1xf32>
    %166 = vector.broadcast %160 : vector<8x1xf32> to vector<8x16xf32>
    %167 = arith.subf %151, %166 : vector<8x16xf32>
    %168 = arith.mulf %167, %167 : vector<8x16xf32>
    %cst_94 = arith.constant dense<0.000000e+00> : vector<8xf32>
    %169 = vector.multi_reduction <add>, %168, %cst_94 [1] : vector<8x16xf32> to vector<8xf32>
    %170 = vector.shape_cast %169 : vector<8xf32> to vector<8x1xf32>
    %171 = arith.addf %165, %170 : vector<8x1xf32>
    %cst_95 = arith.constant 3.200000e+01 : f32
    %172 = vector.broadcast %cst_95 : f32 to vector<8x1xf32>
    %173 = arith.divf %171, %172 : vector<8x1xf32>
    %cst_96 = arith.constant 9.99999974E-6 : f32
    %174 = vector.broadcast %cst_96 : f32 to vector<8x1xf32>
    %175 = arith.addf %173, %174 : vector<8x1xf32>
    %176 = math.rsqrt %175 : vector<8x1xf32>
    %177 = arith.mulf %152, %176 : vector<8x1xf32>
    %178 = arith.mulf %160, %177 : vector<8x1xf32>
    %179 = arith.subf %153, %178 : vector<8x1xf32>
    %180 = vector.broadcast %177 : vector<8x1xf32> to vector<8x16xf32>
    %181 = arith.mulf %148, %180 : vector<8x16xf32>
    %182 = vector.broadcast %179 : vector<8x1xf32> to vector<8x16xf32>
    %183 = arith.addf %181, %182 : vector<8x16xf32>
    %184 = vector.broadcast %177 : vector<8x1xf32> to vector<8x16xf32>
    %185 = arith.mulf %151, %184 : vector<8x16xf32>
    %186 = vector.broadcast %179 : vector<8x1xf32> to vector<8x16xf32>
    %187 = arith.addf %185, %186 : vector<8x16xf32>
    %188 = arith.addf %139, %183 : vector<8x16xf32>
    %cst_97 = arith.constant 0.000000e+00 : f32
    %189 = vector.broadcast %cst_97 : f32 to vector<8x16xf32>
    %190 = arith.maximumf %188, %189 : vector<8x16xf32>
    %c0_98 = arith.constant 0 : index
    %c0_99 = arith.constant 0 : index
    %c0_100 = arith.constant 0 : index
    %191 = vector.load %arg10[%c0_98, %c0_99, %c0_100] : memref<2x8x16xf32, #tpu.memory_space<vmem>>, vector<1x8x16xf32>
    %192 = vector.shape_cast %191 : vector<1x8x16xf32> to vector<8x16xf32>
    %193 = vector.shape_cast %190 : vector<8x16xf32> to vector<1x8x16xf32>
    tpu.vector_store %arg10[%c0_98, %c0_99, %c0_100], %193 {strides = array<i32>} : memref<2x8x16xf32, #tpu.memory_space<vmem>>, vector<1x8x16xf32>,
    %194 = arith.addf %145, %187 : vector<8x16xf32>
    %cst_101 = arith.constant 0.000000e+00 : f32
    %195 = vector.broadcast %cst_101 : f32 to vector<8x16xf32>
    %196 = arith.maximumf %194, %195 : vector<8x16xf32>
    %c1_102 = arith.constant 1 : index
    %c0_103 = arith.constant 0 : index
    %c0_104 = arith.constant 0 : index
    %197 = vector.load %arg10[%c1_102, %c0_103, %c0_104] : memref<2x8x16xf32, #tpu.memory_space<vmem>>, vector<1x8x16xf32>
    %198 = vector.shape_cast %197 : vector<1x8x16xf32> to vector<8x16xf32>
    %199 = vector.shape_cast %196 : vector<8x16xf32> to vector<1x8x16xf32>
    tpu.vector_store %arg10[%c1_102, %c0_103, %c0_104], %199 {strides = array<i32>} : memref<2x8x16xf32, #tpu.memory_space<vmem>>, vector<1x8x16xf32>,
    return
  }
}

</mosaic_0001>

<bundles_post_ra>
// kernel: tpu_custom_call.1
= control target key start
LH: loop header
LB: loop body
LE: loop exit
PB: predicated region body
PF: predicated region fallthrough
CT: control target
= control target key end

     0   :  { %s1426_s17 = smov 127   ;;  %vm49_vm0 = vcmask 1043456   ;;  %v1427_v2 = vmov 0.0   ;;  %s1656_s0 = inlined_call_operand.vmem [shape: f32[2,4,18], index: 0, kind: input, shape index: {}]   ;;  %s1657_s1 = inlined_call_operand.vmem [shape: f32[3,8,4], index: 1, kind: input, shape index: {}]   ;;  %s1658_s2 = inlined_call_operand.vmem [shape: f32[3,8,8], index: 2, kind: input, shape index: {}]   ;;  %s1659_s3 = inlined_call_operand.vmem [shape: f32[8,4], index: 3, kind: input, shape index: {}]   ;;  %s1660_s4 = inlined_call_operand.vmem [shape: f32[8,1], index: 4, kind: input, shape index: {}]   ;;  %s1661_s5 = inlined_call_operand.vmem [shape: f32[8,1], index: 5, kind: input, shape index: {}]   ;;  %s1662_s6 = inlined_call_operand.vmem [shape: f32[8,1], index: 6, kind: input, shape index: {}]   ;;  %s1663_s7 = inlined_call_operand.vmem [shape: f32[8,1], index: 7, kind: input, shape index: {}]   ;;  %s1664_s8 = inlined_call_operand.vmem [shape: f32[8,1], index: 8, kind: input, shape index: {}]   ;;  %s1665_s9 = inlined_call_operand.vmem [shape: f32[8,1], index: 9, kind: input, shape index: {}]   ;;  %s1666_s10 = inlined_call_operand.hbm [shape: f32[2,8,16], index: 10, kind: output, shape index: {}]  }
   0x1   :  { %v36_v0 = vld [vmem:[%s1656_s0] sm:$0xf]  ;;  %v1260_v1 = vld [vmem:[%s1656_s0 + $0x4] sm:$0xf]  ;;  %1317 = vmatprep.subr.mxu0 %v1427_v2  ;;  %1322 = vmatprep.subr.mxu1 %v1427_v2 }
   0x2   :  { %43 = vrot.lane.b32.xlu0 %v36_v0, %s1426_s17  ;;  %278 = vrot.lane.b32.xlu1 %v1260_v1, %s1426_s17 }
   0x3   :  { %15 = vsyncpa [#allocation3], 0  ;;  %vm1428_vm1 = vmmov 0   ;;  %1323 = vmatpush3.msk.msra.mxu1 %vm49_vm0, %v36_v0  ;;  %vm45_vm2 = vcmask 31744   ;;  %v39_v3 = vld [vmem:[%s1657_s1] sm:$0xff]  ;;  %s1429_s19 = smov 126  }
   0x4   :  { %1319 = vmatprep.mubr.msk.f32.mxu0 %vm1428_vm1, %v1427_v2  ;;  %1324 = vmatprep.mubr.msk.f32.mxu1 %vm1428_vm1, %v1427_v2  ;;  %v1261_v4 = vld [vmem:[%s1657_s1 + $0x8] sm:$0xff]  ;;  %v1266_v7 = vld [vmem:[%s1657_s1 + $0x10] sm:$0xff]  ;;  %vm501_vm3 = vcmask 130048   ;;  %v1430_v38 = vmov 0   ;;  %v499_v44 = vld [vmem:[%s1660_s4] sm:$0xff]  ;;  %s1431_s27 = smov 1  }
   0x5   :  { %1332 = vmatprep.subr.mxu1 %v1427_v2  ;;  %1325 = vmatmul.mubr.msk.f32.vlgmr.msra.gmra.mxu1 %vm45_vm2, %v39_v3  ;;  %v500_v47 = vld [vmem:[%s1661_s5] sm:$0xff]  ;;  %vm548_vm4 = vcmask 7168   ;;  %vm550_vm5 = vcmask 138240   ;;  %vm559_vm6 = vcmask 64512  }
   0x6   :  { %199 = vrot.lane.b32.xlu0 %v36_v0, %s1429_s19  ;;  %424 = vrot.lane.b32.xlu1 %v1260_v1, %s1429_s19  ;;  %v552_v59 = vld [vmem:[%s1658_s2] sm:$0xff] }
   0x7   :  { %1334 = vmatprep.mubr.msk.f32.mxu1 %vm1428_vm1, %v1427_v2  ;;  %1396 = vset.pattern.permute.xlu1 %v1430_v38 }
   0x8   :  { %1397 = vset.pattern.permute.xlu0 %v1430_v38 }
  0x74   :  { %v1517_v5 = vpop.permute.xlu0 %43  ;;  %v1519_v6 = vpop.permute.xlu1 %278 }
  0x75   :  { %1318 = vmatpush3.msk.msra.mxu0 %vm49_vm0, %v1517_v5  ;;  %1333 = vmatpush3.msk.msra.mxu1 %vm49_vm0, %v1519_v6 }
  0x76   :  { %1320 = vmatmul.mubr.msk.f32.vlgmr.msra.gmra.mxu0 %vm45_vm2, %v1261_v4  ;;  %1327 = vmatprep.subr.mxu0 %v1427_v2 }
  0x77   :  { %1329 = vmatprep.mubr.msk.f32.mxu0 %vm1428_vm1, %v1427_v2  ;;  %1335 = vmatmul.mubr.msk.f32.vlgmr.msra.gmra.mxu1 %vm45_vm2, %v1261_v4  ;;  %v1279_v4 = vld [vmem:[%s1658_s2 + $0x10] sm:$0xff] }
  0x78   :  { %v200_v8 = vpop.permute.xlu0 %199  ;;  %v425_v9 = vpop.permute.xlu1 %424  ;;  %1342 = vmatprep.subr.mxu1 %v1427_v2  ;;  %1344 = vmatprep.mubr.msk.f32.mxu1 %vm1428_vm1, %v1427_v2 }
  0x79   :  { %1328 = vmatpush3.msk.msra.mxu0 %vm49_vm0, %v200_v8  ;;  %1343 = vmatpush3.msk.msra.mxu1 %vm49_vm0, %v425_v9 }
  0x7a   :  { %1330 = vmatmul.mubr.msk.f32.vlgmr.msra.gmra.mxu0 %vm45_vm2, %v1266_v7  ;;  %1337 = vmatprep.subr.mxu0 %v1427_v2 }
  0x7b   :  { %1338 = vmatpush3.msk.msra.mxu0 %vm49_vm0, %v1260_v1  ;;  %1339 = vmatprep.mubr.msk.f32.mxu0 %vm1428_vm1, %v1427_v2  ;;  %v1275_v1 = vld [vmem:[%s1658_s2 + $0x8] sm:$0xff] }
  0x7c   :  { %1345 = vmatmul.mubr.msk.f32.vlgmr.msra.gmra.mxu1 %vm45_vm2, %v1266_v7  ;;  %1352 = vmatprep.subr.mxu1 %v1427_v2 }
  0x7d   :  { %1347 = vmatprep.subr.mxu0 %v1427_v2  ;;  %1354 = vmatprep.mubr.msk.f32.mxu1 %vm1428_vm1, %v1427_v2 }
  0x7e   :  { %1340 = vmatmul.mubr.msk.f32.vlgmr.msra.gmra.mxu0 %vm45_vm2, %v39_v3 }
  0x7f   :  { %1349 = vmatprep.mubr.msk.f32.mxu0 %vm1428_vm1, %v1427_v2 }
  0xc5   :  { %v193_v10 = vpop.f32.mrf.mxu1 }
  0xc7   :  { %v1326_v11 = vpop.f32.mrf.mxu1 }
 0x136   :  { %v118_v12 = vpop.f32.mrf.mxu0 }
 0x137   :  { %v348_v13 = vpop.f32.mrf.mxu1  ;;  %v194_v15 = vadd.f32 %v193_v10, %v118_v12  ;;  %v1052_v10 = vld [vmem:[%s1659_s3] sm:$0xff] }
 0x138   :  { %v1321_v14 = vpop.f32.mrf.mxu0 }
 0x139   :  { %v1336_v16 = vpop.f32.mrf.mxu1 }
 0x13a   :  { %v272_v17 = vpop.f32.mrf.mxu0 }
 0x13b   :  { %v276_v18 = vadd.f32 %v272_v17, %v194_v15 }
 0x13c   :  { %v1331_v19 = vpop.f32.mrf.mxu0  ;;  %v494_v20 = vpop.f32.mrf.mxu1 }
 0x13d   :  { %v502_v21 = vsel %vm501_vm3, %v276_v18, 0.0 }
 0x13e   :  { %v420_v22 = vpop.f32.mrf.mxu0  ;;  %503 = vadd.xlane.f32.xlu0 %v502_v21  ;;  %v1346_v23 = vpop.f32.mrf.mxu1 }
 0x13f   :  { %v421_v24 = vadd.f32 %v420_v22, %v348_v13 }
 0x140   :  { %v1341_v25 = vpop.f32.mrf.mxu0 }
 0x141   :  { %v498_v26 = vadd.f32 %v494_v20, %v421_v24 }
 0x143   :  { %v505_v27 = vsel %vm501_vm3, %v498_v26, 0.0 }
 0x144   :  { %506 = vadd.xlane.f32.xlu1 %v505_v27 }
 0x1c7   :  { %v504_v28 = vpop.xlane.xlu0 %503 }
 0x1cd   :  { %v507_v29 = vpop.xlane.xlu1 %506 }
 0x1ce   :  { %v508_v30 = vadd.f32 %v507_v29, %v504_v28 }
 0x1d0   :  { %v510_v31 = vmul.f32 0.03125, %v508_v30 }
 0x1d2   :  { %v511_v32 = vsub.f32 %v276_v18, %v510_v31  ;;  %v516_v33 = vsub.f32 %v498_v26, %v510_v31 }
 0x1d4   :  { %v512_v34 = vmul.f32 %v511_v32, %v511_v32  ;;  %v517_v36 = vmul.f32 %v516_v33, %v516_v33 }
 0x1d6   :  { %v513_v35 = vsel %vm501_vm3, %v512_v34, 0.0  ;;  %v518_v37 = vsel %vm501_vm3, %v517_v36, 0.0 }
 0x1d7   :  { %514 = vadd.xlane.f32.xlu0 %v513_v35 }
 0x1db   :  { %519 = vadd.xlane.f32.xlu0 %v518_v37 }
 0x260   :  { %v515_v39 = vpop.xlane.xlu0 %514 }
 0x264   :  { %v520_v40 = vpop.xlane.xlu0 %519 }
 0x265   :  { %v521_v41 = vadd.f32 %v520_v40, %v515_v39 }
 0x267   :  { %v522_v42 = vmul.f32 0.03125, %v521_v41 }
 0x269   :  { %v523_v43 = vadd.f32 1e-05, %v522_v42 }
 0x26b   :  { %1398 = vrsqrt.f32 %v523_v43 }
 0x278   :  { %v1399_v45 = vpop.eup %1398 }
 0x279   :  { %v525_v46 = vmul.f32 %v1399_v45, %v499_v44 }
 0x27b   :  { %530 = vperm.xlu1 %1396, %v525_v46   ;;  %v526_v48 = vmul.f32 %v525_v46, %v510_v31 }
 0x27d   :  { %v527_v49 = vsub.f32 %v500_v47, %v526_v48 }
 0x27f   :  { %536 = vperm.xlu0 %1397, %v527_v49  }
 0x2f6   :  { %v531_v50 = vpop.permute.xlu1 %530 }
 0x2f7   :  { %v533_v51 = vmul.f32 %v531_v50, %v276_v18  ;;  %v541_v53 = vmul.f32 %v531_v50, %v498_v26 }
 0x2fa   :  { %v537_v52 = vpop.permute.xlu0 %536 }
 0x2fb   :  { %v539_v54 = vadd.f32 %v537_v52, %v533_v51  ;;  %v542_v56 = vadd.f32 %v541_v53, %v537_v52 }
 0x2fd   :  { %v540_v55 = vmax.f32 %v539_v54, 0.0  ;;  %v543_v57 = vmax.f32 %v542_v56, 0.0 }
 0x2ff   :  { %545 = vrot.lane.b32.xlu1 %v540_v55, %s1431_s27 }
 0x303   :  { %786 = vrot.lane.b32.xlu1 %v543_v57, %s1431_s27 }
 0x371   :  { %v546_v58 = vpop.permute.xlu1 %545 }
 0x372   :  { %v549_v60 = vsel %vm548_vm4, 0.0, %v546_v58 }
 0x373   :  { %v551_v61 = vsel %vm550_vm5, %v549_v60, 0.0  ;;  %1353 = vmatpush3.msk.msra.mxu1 %vm550_vm5, %v549_v60 }
 0x374   :  { %556 = vrot.lane.b32.xlu1 %v551_v61, %s1426_s17  ;;  %1355 = vmatmul.mubr.msk.f32.vlgmr.msra.gmra.mxu1 %vm559_vm6, %v552_v59 }
 0x375   :  { %v787_v62 = vpop.permute.xlu1 %786  ;;  %1362 = vmatprep.subr.mxu1 %v1427_v2  ;;  %1364 = vmatprep.mubr.msk.f32.mxu1 %vm1428_vm1, %v1427_v2 }
 0x376   :  { %v789_v63 = vsel %vm548_vm4, 0.0, %v787_v62  ;;  %v1009_v62 = vld [vmem:[%s1662_s6] sm:$0xff]  ;;  %s1432_s6 = smov [#allocation2]  }
 0x377   :  { %v790_v0 = vsel %vm550_vm5, %v789_v63, 0.0 }
 0x378   :  { %708 = vrot.lane.b32.xlu1 %v551_v61, %s1429_s19 }
 0x37c   :  { %792 = vrot.lane.b32.xlu1 %v790_v0, %s1426_s17 }
 0x380   :  { %935 = vrot.lane.b32.xlu1 %v790_v0, %s1429_s19 }
 0x3e6   :  { %v557_v3 = vpop.permute.xlu1 %556 }
 0x3e7   :  { %1348 = vmatpush3.msra.mxu0 %v557_v3  ;;  %v1196_v3 = vld [vmem:[%s1664_s8] sm:$0xff] }
 0x3e8   :  { %1350 = vmatmul.mubr.msk.f32.vlgmr.msra.gmra.mxu0 %vm559_vm6, %v1275_v1  ;;  %1357 = vmatprep.subr.mxu0 %v1427_v2 }
 0x3e9   :  { %1359 = vmatprep.mubr.msk.f32.mxu0 %vm1428_vm1, %v1427_v2 }
 0x3ea   :  { %v709_v7 = vpop.permute.xlu1 %708 }
 0x3eb   :  { %1358 = vmatpush3.msra.mxu0 %v709_v7 }
 0x3ec   :  { %1360 = vmatmul.mubr.msk.f32.vlgmr.msra.gmra.mxu0 %vm559_vm6, %v1279_v4  ;;  %1367 = vmatprep.subr.mxu0 %v1427_v2 }
 0x3ed   :  { %1368 = vmatpush3.msk.msra.mxu0 %vm550_vm5, %v789_v63  ;;  %1369 = vmatprep.mubr.msk.f32.mxu0 %vm1428_vm1, %v1427_v2 }
 0x3ee   :  { %v793_v8 = vpop.permute.xlu1 %792  ;;  %1377 = vmatprep.subr.mxu0 %v1427_v2 }
 0x3ef   :  { %1363 = vmatpush3.msra.mxu1 %v793_v8 }
 0x3f0   :  { %1365 = vmatmul.mubr.msk.f32.vlgmr.msra.gmra.mxu1 %vm559_vm6, %v1275_v1  ;;  %1370 = vmatmul.mubr.msk.f32.vlgmr.msra.gmra.mxu0 %vm559_vm6, %v552_v59  ;;  %v1010_v1 = vld [vmem:[%s1663_s7] sm:$0xff]  ;;  %s1249_s7 = sshll.u32 %s1432_s6, 4  ;;  %s1250_s7 = int_to_ptr.vmem [resolvable:$true] %s1249_s7 }
 0x3f1   :  { %1378 = vmatpush3.msk.msra.mxu0 %vm49_vm0, %v1517_v5  ;;  %1372 = vmatprep.subr.mxu1 %v1427_v2  ;;  %s1404_s8 = scalar_lea.vmem %s1250_s7, 256  ;;  %p1409_p1 = scmp.lt.s32.totalorder %s1250_s7, %s1250_s7 }
 0x3f2   :  { %v936_v9 = vpop.permute.xlu1 %935  ;;  %1374 = vmatprep.mubr.msk.f32.mxu1 %vm1428_vm1, %v1427_v2  ;;  %1379 = vmatprep.mubr.msk.f32.mxu0 %vm1428_vm1, %v1427_v2  ;;  %p1405_p0 = scmp.ne.s32.totalorder %s1250_s7, %s1404_s8  ;;  %p1410_p2 = scmp.lt.s32.totalorder %s1404_s8, %s1404_s8 }
 0x3f3   :  { %1373 = vmatpush3.msra.mxu1 %v936_v9 }
 0x3f4   :  { %1375 = vmatmul.mubr.msk.f32.vlgmr.msra.gmra.mxu1 %vm559_vm6, %v1279_v4  ;;  %1382 = vmatprep.subr.mxu1 %v1427_v2  ;;  %p1411_p3 = por %p1410_p2, %p1409_p1 }
 0x3f5   :  { %1383 = vmatpush3.msk.msra.mxu1 %vm49_vm0, %v1519_v6  ;;  %1384 = vmatprep.mubr.msk.f32.mxu1 %vm1428_vm1, %v1427_v2 }
 0x3f6   :  { %1380 = vmatmul.mubr.msk.f32.vlgmr.msra.gmra.mxu0 %vm45_vm2, %v1052_v10  ;;  %p1412_p4 = pnand %p1411_p3, %p1405_p0 }
 0x3f8   :  { %1385 = vmatmul.mubr.msk.f32.vlgmr.msra.gmra.mxu1 %vm45_vm2, %v1052_v10  ;;  %v1197_v10 = vld [vmem:[%s1665_s9] sm:$0xff] }
 0x434   :  { %v702_v5 = vpop.f32.mrf.mxu1 }
 0x436   :  { %v1356_v11 = vpop.f32.mrf.mxu1 }
 0x4a8   :  { %v629_v12 = vpop.f32.mrf.mxu0 }
 0x4a9   :  { %v703_v13 = vadd.f32 %v702_v5, %v629_v12 }
 0x4aa   :  { %v1351_v14 = vpop.f32.mrf.mxu0 }
 0x4ac   :  { %v780_v15 = vpop.f32.mrf.mxu0 }
 0x4ad   :  { %v1611_v16 = vadd.f32 %v780_v15, %v703_v13 }
 0x4ae   :  { %v1361_v17 = vpop.f32.mrf.mxu0 }
 0x4af   :  { %v1011_v18 = vsel %vm501_vm3, %v1611_v16, 0.0 }
 0x4b0   :  { %v861_v6 = vpop.f32.mrf.mxu1  ;;  %v931_v19 = vpop.f32.mrf.mxu0  ;;  %1012 = vadd.xlane.f32.xlu1 %v1011_v18 }
 0x4b1   :  { %v932_v21 = vadd.f32 %v931_v19, %v861_v6 }
 0x4b2   :  { %v1366_v2 = vpop.f32.mrf.mxu1  ;;  %v1371_v20 = vpop.f32.mrf.mxu0 }
 0x4b4   :  { %v1004_v22 = vpop.f32.mrf.mxu1 }
 0x4b5   :  { %v1615_v23 = vadd.f32 %v1004_v22, %v932_v21 }
 0x4b6   :  { %v1376_v24 = vpop.f32.mrf.mxu1  ;;  %v1617_v25 = vpop.f32.mrf.mxu0 }
 0x4b7   :  { %v1014_v26 = vsel %vm501_vm3, %v1615_v23, 0.0  ;;  %v1198_v27 = vsel %vm501_vm3, %v1617_v25, 0.0 }
 0x4b8   :  { %1015 = vadd.xlane.f32.xlu0 %v1014_v26  ;;  %v1623_v28 = vpop.f32.mrf.mxu1  ;;  %1199 = vadd.xlane.f32.xlu1 %v1198_v27  ;;  %v1381_v29 = vpop.f32.mrf.mxu0 }
 0x4b9   :  { %v1201_v30 = vsel %vm501_vm3, %v1623_v28, 0.0 }
 0x4ba   :  { %v1386_v31 = vpop.f32.mrf.mxu1 }
 0x4bc   :  { %1202 = vadd.xlane.f32.xlu0 %v1201_v30 }
 0x539   :  { %v1013_v32 = vpop.xlane.xlu1 %1012 }
 0x541   :  { %v1016_v33 = vpop.xlane.xlu0 %1015  ;;  %v1200_v35 = vpop.xlane.xlu1 %1199 }
 0x542   :  { %v1017_v34 = vadd.f32 %v1016_v33, %v1013_v32 }
 0x544   :  { %v1018_v36 = vmul.f32 0.03125, %v1017_v34 }
 0x545   :  { %v1203_v37 = vpop.xlane.xlu0 %1202 }
 0x546   :  { %v1204_v38 = vadd.f32 %v1203_v37, %v1200_v35  ;;  %v1019_v39 = vsub.f32 %v1611_v16, %v1018_v36  ;;  %v1024_v40 = vsub.f32 %v1615_v23, %v1018_v36 }
 0x548   :  { %v1205_v41 = vmul.f32 0.03125, %v1204_v38  ;;  %v1020_v42 = vmul.f32 %v1019_v39, %v1019_v39  ;;  %v1025_v43 = vmul.f32 %v1024_v40, %v1024_v40 }
 0x54a   :  { %v1021_v44 = vsel %vm501_vm3, %v1020_v42, 0.0  ;;  %v1026_v45 = vsel %vm501_vm3, %v1025_v43, 0.0  ;;  %v1211_v46 = vsub.f32 %v1623_v28, %v1205_v41  ;;  %v1206_v47 = vsub.f32 %v1617_v25, %v1205_v41 }
 0x54b   :  { %1022 = vadd.xlane.f32.xlu1 %v1021_v44  ;;  %1027 = vadd.xlane.f32.xlu0 %v1026_v45 }
 0x54c   :  { %v1212_v48 = vmul.f32 %v1211_v46, %v1211_v46  ;;  %v1207_v49 = vmul.f32 %v1206_v47, %v1206_v47 }
 0x54e   :  { %v1213_v50 = vsel %vm501_vm3, %v1212_v48, 0.0  ;;  %v1208_v51 = vsel %vm501_vm3, %v1207_v49, 0.0 }
 0x54f   :  { %1214 = vadd.xlane.f32.xlu0 %v1213_v50  ;;  %1209 = vadd.xlane.f32.xlu1 %v1208_v51 }
 0x5d4   :  { %v1023_v52 = vpop.xlane.xlu1 %1022  ;;  %v1028_v53 = vpop.xlane.xlu0 %1027 }
 0x5d5   :  { %v1029_v54 = vadd.f32 %v1028_v53, %v1023_v52 }
 0x5d7   :  { %v1030_v55 = vmul.f32 0.03125, %v1029_v54 }
 0x5d8   :  { %v1210_v56 = vpop.xlane.xlu1 %1209  ;;  %v1215_v57 = vpop.xlane.xlu0 %1214 }
 0x5d9   :  { %v1031_v58 = vadd.f32 1e-05, %v1030_v55  ;;  %v1216_v59 = vadd.f32 %v1215_v57, %v1210_v56 }
 0x5db   :  { %1400 = vrsqrt.f32 %v1031_v58  ;;  %v1217_v60 = vmul.f32 0.03125, %v1216_v59 }
 0x5dd   :  { %v1218_v61 = vadd.f32 1e-05, %v1217_v60 }
 0x5df   :  { %1402 = vrsqrt.f32 %v1218_v61 }
 0x5e8   :  { %v1401_v63 = vpop.eup %1400 }
 0x5e9   :  { %v1033_v0 = vmul.f32 %v1401_v63, %v1009_v62 }
 0x5eb   :  { %1038 = vperm.xlu1 %1396, %v1033_v0   ;;  %v1034_v4 = vmul.f32 %v1033_v0, %v1018_v36 }
 0x5ec   :  { %v1403_v7 = vpop.eup %1402 }
 0x5ed   :  { %v1035_v8 = vsub.f32 %v1010_v1, %v1034_v4  ;;  %v1220_v9 = vmul.f32 %v1403_v7, %v1196_v3 }
 0x5ef   :  { %1044 = vperm.xlu0 %1397, %v1035_v8   ;;  %1225 = vperm.xlu1 %1396, %v1220_v9   ;;  %v1221_v5 = vmul.f32 %v1220_v9, %v1205_v41 }
 0x5f1   :  { %v1222_v11 = vsub.f32 %v1197_v10, %v1221_v5 }
 0x5f3   :  { %1231 = vperm.xlu1 %1396, %v1222_v11  }
 0x666   :  { %v1039_v12 = vpop.permute.xlu1 %1038 }
 0x667   :  { %v1041_v13 = vmul.f32 %v1039_v12, %v1611_v16  ;;  %v1049_v14 = vmul.f32 %v1039_v12, %v1615_v23 }
 0x66a   :  { %v1226_v15 = vpop.permute.xlu1 %1225  ;;  %v1045_v17 = vpop.permute.xlu0 %1044 }
 0x66b   :  { %v1047_v18 = vadd.f32 %v1045_v17, %v1041_v13  ;;  %v1050_v6 = vadd.f32 %v1049_v14, %v1045_v17  ;;  %v1228_v19 = vmul.f32 %v1226_v15, %v1617_v25  ;;  %v1235_v2 = vmul.f32 %v1226_v15, %v1623_v28 }
 0x66d   :  { %v1048_v21 = vmax.f32 %v1047_v18, 0.0  ;;  %v1051_v22 = vmax.f32 %v1050_v6, 0.0 }
 0x66e   :  { %v1232_v20 = vpop.permute.xlu1 %1231 }
 0x66f   :  { %v1234_v24 = vadd.f32 %v1232_v20, %v1228_v19  ;;  %v1236_v26 = vadd.f32 %v1235_v2, %v1232_v20 }
 0x671   :  { %v1237_v27 = vadd.f32 %v1234_v24, %v1048_v21  ;;  %v1240_v29 = vadd.f32 %v1236_v26, %v1051_v22 }
 0x673   :  { %v1238_v16 = vmax.f32 %v1237_v27, 0.0  ;;  %v1241_v30 = vmax.f32 %v1240_v29, 0.0 }
 0x675   :  { %1239 = vst.msk [vmem:[#allocation2] sm:$0xff] %vm501_vm3, %v1238_v16  ;;  %1243 = vst.msk [vmem:[#allocation2 + $0x8] sm:$0xff] %vm501_vm3, %v1241_v30 }
 0x676   :  { %1415 = shalt.err (!%p1412_p4)
}
 0x677   :  { %s1433_s9 = smov 128   ;;  %s1434_s19 = smov 8  }
 0x678   :  { %1255 = dma.vmem_to_hbm [thread:$0]  %s1250_s7, 256, %s1666_s10, [#allocation3], %s1433_s9, %s1433_s9, %s1434_s19  }
 0x679   :  { %1424 = dma.done.wait [#allocation3], 256  }
 0x67a   :  { %1425 = vsyncadd [#allocation3], 4294967040 }
 0x67b   :  { %1259 = vsyncpa [#allocation3], 1 }

</bundles_post_ra>
